<compile_context>
chip_gen: v6e
topology: v6e:2x2x1
jax: 0.10.0
libtpu: 0.0.40
codegen_flags: <defaults>
</compile_context>

<pallas_src>
import functools

import jax
import jax.numpy as jnp
from jax.experimental import pallas as pl
from jax.experimental.pallas import tpu as pltpu


def _conv3x3_bias_relu_kernel(x_ref, w_ref, b_ref, o_ref, *, h):
    # x_ref: (1, H+2, W*Cin)   bf16 row-padded NHWC image (one batch element)
    # w_ref: (3, W*Cin, tj)    bf16 banded weights, one slab per dy tap
    # b_ref: (1, tj)           f32 bias tiled across W
    # o_ref: (1, H, tj)        bf16 output tile (lane-dense last dim)
    acc = jnp.dot(x_ref[0, 0:h, :], w_ref[0],
                  preferred_element_type=jnp.float32)
    acc = acc + jnp.dot(x_ref[0, 1:h + 1, :], w_ref[1],
                        preferred_element_type=jnp.float32)
    acc = acc + jnp.dot(x_ref[0, 2:h + 2, :], w_ref[2],
                        preferred_element_type=jnp.float32)
    acc = jnp.maximum(acc + b_ref[...], 0.0)      # bias + ReLU, one fused f32 pass
    o_ref[0] = acc.astype(o_ref.dtype)            # single bf16 cast at the store


def conv_block_forward(x_nchw, weight_oihw, bias, *, wcout_block=None,
                       output_layout="nchw"):
    """relu(conv2d(x, weight, bias, stride=1, padding=1)).

    output_layout:
      "nchw"      -> (N, Cout, H, W) in x.dtype (matches the PyTorch module).
      "nhwc_flat" -> (N, H, W*Cout) bf16; skips the NCHW relayout pass (use this
                     between fused layers, transpose only at model boundaries).
    """
    N, Cin, H, W = x_nchw.shape
    Cout = weight_oihw.shape[0]
    wcin = W * Cin
    wcout = W * Cout

    # Output-column (W*Cout) tile: largest 128-multiple divisor <= 512, else full.
    if wcout_block is None:
        wcout_block = wcout
        for cand in (512, 384, 256, 128):
            if wcout % cand == 0:
                wcout_block = cand
                break
    tj = int(wcout_block)
    assert wcout % tj == 0, "wcout_block must divide W*Cout"
    n_j = wcout // tj

    # ---- layout glue (one fused XLA pass: transpose + row-pad + bf16 cast) ---
    # TODO(synk): in a full model keep activations in this (N, H, W*C) bf16
    # layout between ConvBlocks so this transpose disappears entirely.
    x_nhwc = jnp.transpose(x_nchw, (0, 2, 3, 1)).astype(jnp.bfloat16)
    x_flat = jnp.pad(x_nhwc, ((0, 0), (1, 1), (0, 0), (0, 0))).reshape(N, H + 2, wcin)

    # Banded weights with the width padding folded away:
    #   Wband[dy, w'*Cin + c, w*Cout + o] = weight[o, c, dy, dx]  iff w' == w + dx - 1
    # Taps with w' < 0 or w' >= W are dropped -> implicit zero padding along W.
    wt = jnp.transpose(weight_oihw, (2, 3, 1, 0)).astype(jnp.float32)     # (3,3,Cin,Cout)
    shifts = jnp.stack([jnp.eye(W, k=1 - dx, dtype=jnp.float32) for dx in range(3)])
    w_band = jnp.einsum("xpw,yxco->ypcwo", shifts, wt)                    # (3,W,Cin,W,Cout)
    w_band = w_band.reshape(3, wcin, wcout).astype(jnp.bfloat16)

    b_row = jnp.tile(bias.astype(jnp.float32), W).reshape(1, wcout)

    kernel = functools.partial(_conv3x3_bias_relu_kernel, h=H)

    out_flat = pl.pallas_call(
        kernel,
        out_shape=jax.ShapeDtypeStruct((N, H, wcout), jnp.bfloat16),
        grid_spec=pltpu.PrefetchScalarGridSpec(
            num_scalar_prefetch=0,
            grid=(N, n_j),
            in_specs=[
                # x block index is constant along j -> fetched once per batch image.
                pl.BlockSpec((1, H + 2, wcin), lambda n, j: (n, 0, 0)),
                pl.BlockSpec((3, wcin, tj), lambda n, j: (0, 0, j)),
                pl.BlockSpec((1, tj), lambda n, j: (0, j)),
            ],
            out_specs=pl.BlockSpec((1, H, tj), lambda n, j: (n, 0, j)),
        ),
        compiler_params=pltpu.CompilerParams(
            dimension_semantics=("parallel", "parallel")),
    )(x_flat, w_band, b_row)

    if output_layout == "nhwc_flat":
        return out_flat
    out = out_flat.reshape(N, H, W, Cout)
    return jnp.transpose(out, (0, 3, 1, 2)).astype(x_nchw.dtype)


def _reference_forward(x_nchw, weight_oihw, bias):
    """Pure-JAX f32 reference (lax conv) for correctness checking."""
    y = jax.lax.conv_general_dilated(
        x_nchw.astype(jnp.float32), weight_oihw.astype(jnp.float32),
        window_strides=(1, 1), padding=((1, 1), (1, 1)),
        dimension_numbers=("NCHW", "OIHW", "NCHW"))
    y = y + bias.reshape(1, -1, 1, 1)
    return jnp.maximum(y, 0.0)


if __name__ == "__main__":
    # Small shapes consistent with ConvBlock(in_channels=4, out_channels=8, cfg)
    N, Cin, H, W = 2, 4, 16, 16
    Cout = 8

    key = jax.random.PRNGKey(0)
    kx, kw, kb = jax.random.split(key, 3)

    x = jax.random.normal(kx, (N, Cin, H, W), dtype=jnp.float32)
    weight = jax.random.normal(kw, (Cout, Cin, 3, 3), dtype=jnp.float32)
    weight = weight * (1.0 / jnp.sqrt(Cin * 9.0))
    bias = jax.random.normal(kb, (Cout,), dtype=jnp.float32) * 0.01

    ref = jax.block_until_ready(_reference_forward(x, weight, bias))

    fwd = jax.jit(conv_block_forward,
                  static_argnames=("wcout_block", "output_layout"))

    # Module-faithful NCHW output (grid (N, 1) here).
    out = jax.block_until_ready(fwd(x, weight, bias))
    assert out.shape == (N, Cout, H, W)
    assert jnp.allclose(out, ref, atol=3e-2, rtol=3e-2), "mismatch vs reference"

    # Fused-layer layout: skip the NCHW relayout pass, keep bf16 activations.
    out_flat = jax.block_until_ready(fwd(x, weight, bias, output_layout="nhwc_flat"))
    ref_flat = jnp.transpose(ref, (0, 2, 3, 1)).reshape(N, H, W * Cout)
    assert jnp.allclose(out_flat.astype(jnp.float32), ref_flat,
                        atol=3e-2, rtol=3e-2), "nhwc_flat mismatch"

    # Exercise the W*Cout column-tiling grid axis (Cout=16 -> wcout=256, tj=128,
    # grid (2, 2)).
    Cout2 = 16
    kw2, kb2 = jax.random.split(kw)
    weight2 = jax.random.normal(kw2, (Cout2, Cin, 3, 3), dtype=jnp.float32)
    weight2 = weight2 * (1.0 / jnp.sqrt(Cin * 9.0))
    bias2 = jax.random.normal(kb2, (Cout2,), dtype=jnp.float32) * 0.01
    ref2 = jax.block_until_ready(_reference_forward(x, weight2, bias2))
    out2 = jax.block_until_ready(fwd(x, weight2, bias2, wcout_block=128))
    assert jnp.allclose(out2, ref2, atol=3e-2, rtol=3e-2), "tiled-wcout mismatch"

    print("KERNEL_OK")
</pallas_src>

<mosaic_0001>
module attributes {stable_mosaic.version = 11 : i64} {
  func.func @_conv3x3_bias_relu_kernel(%arg0: i32, %arg1: i32, %arg2: memref<1x18x64xbf16, #tpu.memory_space<vmem>>, %arg3: memref<3x64x128xbf16, #tpu.memory_space<vmem>>, %arg4: memref<1x128xf32, #tpu.memory_space<vmem>>, %arg5: memref<1x16x128xbf16, #tpu.memory_space<vmem>>) attributes {dimension_semantics = [#tpu.dimension_semantics<parallel>, #tpu.dimension_semantics<parallel>], iteration_bounds = array<i64: 2, 1>, scalar_prefetch = 0 : i64, scratch_operands = 0 : i64, tpu.core_type = #tpu.core_type<tc>, window_params = [{transform_indices = @transform_0, window_bounds = array<i64: 1, 18, 64>}, {transform_indices = @transform_1, window_bounds = array<i64: 3, 64, 128>}, {transform_indices = @transform_2, window_bounds = array<i64: 1, 128>}, {transform_indices = @transform_3, window_bounds = array<i64: 1, 16, 128>}]} {
    %c0 = arith.constant 0 : index
    %c0_0 = arith.constant 0 : index
    %c0_1 = arith.constant 0 : index
    %0 = vector.load %arg2[%c0, %c0_0, %c0_1] : memref<1x18x64xbf16, #tpu.memory_space<vmem>>, vector<1x16x64xbf16>
    %1 = vector.shape_cast %0 : vector<1x16x64xbf16> to vector<16x64xbf16>
    %c0_2 = arith.constant 0 : index
    %c0_3 = arith.constant 0 : index
    %c0_4 = arith.constant 0 : index
    %2 = vector.load %arg3[%c0_2, %c0_3, %c0_4] : memref<3x64x128xbf16, #tpu.memory_space<vmem>>, vector<1x64x128xbf16>
    %3 = vector.shape_cast %2 : vector<1x64x128xbf16> to vector<64x128xbf16>
    %cst = arith.constant dense<0.000000e+00> : vector<16x128xf32>
    %4 = tpu.matmul %1, %3, %cst {dimension_numbers = #tpu.dot_dimension_numbers<[1], [0], [0], [1], [0, 0, 1, 1], [], []>} : vector<16x64xbf16>, vector<64x128xbf16>, vector<16x128xf32> -> vector<16x128xf32>
    %c0_5 = arith.constant 0 : index
    %c1 = arith.constant 1 : index
    %c0_6 = arith.constant 0 : index
    %5 = vector.load %arg2[%c0_5, %c1, %c0_6] : memref<1x18x64xbf16, #tpu.memory_space<vmem>>, vector<1x16x64xbf16>
    %6 = vector.shape_cast %5 : vector<1x16x64xbf16> to vector<16x64xbf16>
    %c1_7 = arith.constant 1 : index
    %c0_8 = arith.constant 0 : index
    %c0_9 = arith.constant 0 : index
    %7 = vector.load %arg3[%c1_7, %c0_8, %c0_9] : memref<3x64x128xbf16, #tpu.memory_space<vmem>>, vector<1x64x128xbf16>
    %8 = vector.shape_cast %7 : vector<1x64x128xbf16> to vector<64x128xbf16>
    %cst_10 = arith.constant dense<0.000000e+00> : vector<16x128xf32>
    %9 = tpu.matmul %6, %8, %cst_10 {dimension_numbers = #tpu.dot_dimension_numbers<[1], [0], [0], [1], [0, 0, 1, 1], [], []>} : vector<16x64xbf16>, vector<64x128xbf16>, vector<16x128xf32> -> vector<16x128xf32>
    %10 = arith.addf %4, %9 : vector<16x128xf32>
    %c0_11 = arith.constant 0 : index
    %c2 = arith.constant 2 : index
    %c0_12 = arith.constant 0 : index
    %11 = vector.load %arg2[%c0_11, %c2, %c0_12] : memref<1x18x64xbf16, #tpu.memory_space<vmem>>, vector<1x16x64xbf16>
    %12 = vector.shape_cast %11 : vector<1x16x64xbf16> to vector<16x64xbf16>
    %c2_13 = arith.constant 2 : index
    %c0_14 = arith.constant 0 : index
    %c0_15 = arith.constant 0 : index
    %13 = vector.load %arg3[%c2_13, %c0_14, %c0_15] : memref<3x64x128xbf16, #tpu.memory_space<vmem>>, vector<1x64x128xbf16>
    %14 = vector.shape_cast %13 : vector<1x64x128xbf16> to vector<64x128xbf16>
    %cst_16 = arith.constant dense<0.000000e+00> : vector<16x128xf32>
    %15 = tpu.matmul %12, %14, %cst_16 {dimension_numbers = #tpu.dot_dimension_numbers<[1], [0], [0], [1], [0, 0, 1, 1], [], []>} : vector<16x64xbf16>, vector<64x128xbf16>, vector<16x128xf32> -> vector<16x128xf32>
    %16 = arith.addf %10, %15 : vector<16x128xf32>
    %c0_17 = arith.constant 0 : index
    %c0_18 = arith.constant 0 : index
    %17 = vector.load %arg4[%c0_17, %c0_18] : memref<1x128xf32, #tpu.memory_space<vmem>>, vector<1x128xf32>
    %18 = vector.broadcast %17 : vector<1x128xf32> to vector<16x128xf32>
    %19 = arith.addf %16, %18 : vector<16x128xf32>
    %cst_19 = arith.constant 0.000000e+00 : f32
    %20 = vector.broadcast %cst_19 : f32 to vector<16x128xf32>
    %21 = arith.maximumf %19, %20 : vector<16x128xf32>
    %22 = arith.truncf %21 : vector<16x128xf32> to vector<16x128xbf16>
    %c0_20 = arith.constant 0 : index
    %c0_21 = arith.constant 0 : index
    %c0_22 = arith.constant 0 : index
    %23 = vector.load %arg5[%c0_20, %c0_21, %c0_22] : memref<1x16x128xbf16, #tpu.memory_space<vmem>>, vector<1x16x128xbf16>
    %24 = vector.shape_cast %23 : vector<1x16x128xbf16> to vector<16x128xbf16>
    %25 = vector.shape_cast %22 : vector<16x128xbf16> to vector<1x16x128xbf16>
    tpu.vector_store %arg5[%c0_20, %c0_21, %c0_22], %25 {strides = array<i32>} : memref<1x16x128xbf16, #tpu.memory_space<vmem>>, vector<1x16x128xbf16>,
    return
  }
  func.func @transform_0(%arg0: i32, %arg1: i32) -> (i32, i32, i32) {
    %c0_i32 = arith.constant 0 : i32
    %c0_i32_0 = arith.constant 0 : i32
    %c0_i32_1 = arith.constant 0 : i32
    return %arg0, %c0_i32, %c0_i32_0 : i32, i32, i32
  }
  func.func @transform_1(%arg0: i32, %arg1: i32) -> (i32, i32, i32) {
    %c0_i32 = arith.constant 0 : i32
    %c0_i32_0 = arith.constant 0 : i32
    %c0_i32_1 = arith.constant 0 : i32
    return %c0_i32, %c0_i32_0, %arg1 : i32, i32, i32
  }
  func.func @transform_2(%arg0: i32, %arg1: i32) -> (i32, i32) {
    %c0_i32 = arith.constant 0 : i32
    %c0_i32_0 = arith.constant 0 : i32
    return %c0_i32, %arg1 : i32, i32
  }
  func.func @transform_3(%arg0: i32, %arg1: i32) -> (i32, i32, i32) {
    %c0_i32 = arith.constant 0 : i32
    %c0_i32_0 = arith.constant 0 : i32
    return %arg0, %c0_i32, %arg1 : i32, i32, i32
  }
}

</mosaic_0001>

<bundles_post_ra>
// kernel: tile.8
= control target key start
LH: loop header
LB: loop body
LE: loop exit
PB: predicated region body
PF: predicated region fallthrough
CT: control target
= control target key end

     0   :  { %s28_s0 = inlined_call_operand.vmem [shape: f32[8], index: 0, kind: input, shape index: {}]   ;;  %s29_s1 = inlined_call_operand.vmem [shape: f32[16,8], index: 1, kind: output, shape index: {}]  }
   0x1   :  { %v4_v0 = vld [vmem:[%s28_s0] ss:$0 sm:$0xff] }
   0x2   :  { %5 = vst [vmem:[%s29_s1] sm:$0xff] %v4_v0  ;;  %8 = vst [vmem:[%s29_s1 + $0x8] sm:$0xff] %v4_v0 }

// kernel: tile.9
= control target key start
LH: loop header
LB: loop body
LE: loop exit
PB: predicated region body
PF: predicated region fallthrough
CT: control target
= control target key end

     0   :  { %s133_s10 = smov 120   ;;  %s134_s11 = smov 104   ;;  %vm3_vm0 = vcmask 64512   ;;  %vm9_vm1 = vcmask 1048512   ;;  %vm15_vm2 = vcmask 982912   ;;  %vm21_vm3 = vcmask 917312   ;;  %s209_s0 = inlined_call_operand.vmem [shape: f32[16,8], index: 0, kind: input, shape index: {}]   ;;  %s210_s1 = inlined_call_operand.vmem [shape: f32[1,128], index: 1, kind: output, shape index: {}]  }
   0x1   :  { %v103_v0 = vld [vmem:[%s209_s0 + $0xf] sm:$0x1]   ;;  %v105_v1 = vld [vmem:[%s209_s0 + $0xd] sm:$0x1]   ;;  %v104_v2 = vld [vmem:[%s209_s0 + $0xe] sm:$0x1]  }
   0x2   :  { %7 = vrot.lane.b32.xlu0 %v103_v0, %s133_s10  ;;  %19 = vrot.lane.b32.xlu1 %v105_v1, %s134_s11  ;;  %v106_v3 = vld [vmem:[%s209_s0 + $0xc] sm:$0x1]   ;;  %s135_s16 = smov 112   ;;  %s136_s17 = smov 96   ;;  %v107_v4 = vld [vmem:[%s209_s0 + $0xb] sm:$0x1]  }
   0x3   :  { %v108_v5 = vld [vmem:[%s209_s0 + $0xa] sm:$0x1]   ;;  %v2_v6 = vld [vmem:[%s209_s0] sm:$0x1]   ;;  %s137_s24 = smov 88   ;;  %s138_s25 = smov 80  }
   0x4   :  { %4 = vst.msk [vmem:[#allocation0] sm:$0x1] %vm3_vm0, %v2_v6   ;;  %v109_v7 = vld [vmem:[%s209_s0 + $0x9] sm:$0x1]   ;;  %v110_v8 = vld [vmem:[%s209_s0 + $0x8] sm:$0x1]  }
   0x5   :  { %s139_s30 = smov 72   ;;  %s140_s2 = smov 64   ;;  %v111_v9 = vld [vmem:[%s209_s0 + $0x7] sm:$0x1]   ;;  %v112_v10 = vld [vmem:[%s209_s0 + $0x6] sm:$0x1]  }
   0x6   :  { %13 = vrot.lane.b32.xlu0 %v104_v2, %s135_s16  ;;  %25 = vrot.lane.b32.xlu1 %v106_v3, %s136_s17  ;;  %s141_s7 = smov 56   ;;  %s142_s8 = smov 48   ;;  %v113_v11 = vld [vmem:[%s209_s0 + $0x5] sm:$0x1]   ;;  %v114_v12 = vld [vmem:[%s209_s0 + $0x4] sm:$0x1]  }
   0x7   :  { %s143_s13 = smov 40   ;;  %s144_s14 = smov 32   ;;  %v115_v13 = vld [vmem:[%s209_s0 + $0x3] sm:$0x1]   ;;  %v116_v14 = vld [vmem:[%s209_s0 + $0x2] sm:$0x1]  }
   0x8   :  { %s145_s19 = smov 24   ;;  %s146_s20 = smov 16   ;;  %v117_v15 = vld [vmem:[%s209_s0 + $0x1] sm:$0x1]   ;;  %vm27_vm4 = vcmask 851712   ;;  %vm33_vm5 = vcmask 786112  }
   0x9   :  { %s147_s0 = smov 8   ;;  %vm39_vm6 = vcmask 720512   ;;  %vm45_vm7 = vcmask 654912   ;;  %vm51_vm8 = vcmask 589312   ;;  %vm57_vm9 = vcmask 523712  }
   0xa   :  { %31 = vrot.lane.b32.xlu0 %v107_v4, %s137_s24  ;;  %37 = vrot.lane.b32.xlu1 %v108_v5, %s138_s25  ;;  %vm63_vm10 = vcmask 458112   ;;  %vm69_vm11 = vcmask 392512   ;;  %vm75_vm12 = vcmask 326912   ;;  %vm81_vm13 = vcmask 261312  }
   0xb   :  { %vm87_vm14 = vcmask 195712   ;;  %vm93_vm15 = vcmask 130112  }
   0xe   :  { %43 = vrot.lane.b32.xlu0 %v109_v7, %s139_s30  ;;  %49 = vrot.lane.b32.xlu1 %v110_v8, %s140_s2 }
  0x12   :  { %55 = vrot.lane.b32.xlu0 %v111_v9, %s141_s7  ;;  %61 = vrot.lane.b32.xlu1 %v112_v10, %s142_s8 }
  0x16   :  { %67 = vrot.lane.b32.xlu0 %v113_v11, %s143_s13  ;;  %73 = vrot.lane.b32.xlu1 %v114_v12, %s144_s14 }
  0x1a   :  { %79 = vrot.lane.b32.xlu0 %v115_v13, %s145_s19  ;;  %85 = vrot.lane.b32.xlu1 %v116_v14, %s146_s20 }
  0x1e   :  { %91 = vrot.lane.b32.xlu0 %v117_v15, %s147_s0 }
  0x74   :  { %v8_v16 = vpop.permute.xlu0 %7   ;;  %v20_v17 = vpop.permute.xlu1 %19  }
  0x75   :  { %10 = vst.msk [vmem:[#allocation0] sm:$0x1] %vm9_vm1, %v8_v16  }
  0x78   :  { %v14_v18 = vpop.permute.xlu0 %13   ;;  %v26_v19 = vpop.permute.xlu1 %25  }
  0x79   :  { %16 = vst.msk [vmem:[#allocation0] sm:$0x1] %vm15_vm2, %v14_v18  }
  0x7a   :  { %22 = vst.msk [vmem:[#allocation0] sm:$0x1] %vm21_vm3, %v20_v17  }
  0x7b   :  { %28 = vst.msk [vmem:[#allocation0] sm:$0x1] %vm27_vm4, %v26_v19  }
  0x7c   :  { %v32_v20 = vpop.permute.xlu0 %31   ;;  %v38_v21 = vpop.permute.xlu1 %37  }
  0x7d   :  { %34 = vst.msk [vmem:[#allocation0] sm:$0x1] %vm33_vm5, %v32_v20  }
  0x7e   :  { %40 = vst.msk [vmem:[#allocation0] sm:$0x1] %vm39_vm6, %v38_v21  }
  0x80   :  { %v44_v22 = vpop.permute.xlu0 %43   ;;  %v50_v23 = vpop.permute.xlu1 %49  }
  0x81   :  { %46 = vst.msk [vmem:[#allocation0] sm:$0x1] %vm45_vm7, %v44_v22  }
  0x82   :  { %52 = vst.msk [vmem:[#allocation0] sm:$0x1] %vm51_vm8, %v50_v23  }
  0x84   :  { %v56_v24 = vpop.permute.xlu0 %55   ;;  %v62_v25 = vpop.permute.xlu1 %61  }
  0x85   :  { %58 = vst.msk [vmem:[#allocation0] sm:$0x1] %vm57_vm9, %v56_v24  }
  0x86   :  { %64 = vst.msk [vmem:[#allocation0] sm:$0x1] %vm63_vm10, %v62_v25  }
  0x88   :  { %v68_v26 = vpop.permute.xlu0 %67   ;;  %v74_v27 = vpop.permute.xlu1 %73  }
  0x89   :  { %70 = vst.msk [vmem:[#allocation0] sm:$0x1] %vm69_vm11, %v68_v26  }
  0x8a   :  { %76 = vst.msk [vmem:[#allocation0] sm:$0x1] %vm75_vm12, %v74_v27  }
  0x8c   :  { %v80_v28 = vpop.permute.xlu0 %79   ;;  %v86_v29 = vpop.permute.xlu1 %85  }
  0x8d   :  { %82 = vst.msk [vmem:[#allocation0] sm:$0x1] %vm81_vm13, %v80_v28  }
  0x8e   :  { %88 = vst.msk [vmem:[#allocation0] sm:$0x1] %vm87_vm14, %v86_v29  }
  0x90   :  { %v92_v30 = vpop.permute.xlu0 %91  }
  0x91   :  { %94 = vst.msk [vmem:[#allocation0] sm:$0x1] %vm93_vm15, %v92_v30  }
  0x98   :  { %v99_v31 = vld [vmem:[#allocation0] sm:$0x1] }
  0x99   :  { %102 = vst [vmem:[%s210_s1] sm:$0x1] %v99_v31 }

// kernel: conv_block_forward.1
= control target key start
LH: loop header
LB: loop body
LE: loop exit
PB: predicated region body
PF: predicated region fallthrough
CT: control target
= control target key end

     0   :  { %s809_s12 = smov 0   ;;  %s811_s13 = smov 0   ;;  %s891_s0 = inlined_call_operand.vmem [shape: bf16[2,18,64], index: 0, kind: input, shape index: {}]   ;;  %s892_s1 = inlined_call_operand.vmem [shape: bf16[3,64,128], index: 1, kind: input, shape index: {}]   ;;  %s893_s2 = inlined_call_operand.vmem [shape: f32[1,128], index: 2, kind: input, shape index: {}]   ;;  %s894_s3 = inlined_call_operand.vmem [shape: bf16[2,16,128], index: 3, kind: output, shape index: {}]  }
   0x1   :  { %s813_s14 = smov 0  }
   0x2 LB: > { %s25_s15 = sadd.s32 1, %s781_s13  ;;  %p619_p0 = scmp.ge.s32.totalorder %s785_s14, 1  ;;  %s785_s14 = sphi %s813_s14, %s13_s14   ;;  %s781_s13 = sphi %s811_s13, %s896_s13   ;;  %s777_s12 = sphi %s809_s12, %s895_s12  }
   0x3   : > { %p27_p1 = scmp.ge.s32.totalorder %s25_s15, 2  ;;  %p168_p2 = scmp.lt.s32.totalorder %s785_s14, 3 }
   0x5   : > { %s898_s15 = smov (%p27_p1, %s25_s15), 0  ;;  %p169_p3 = pnand %p619_p0, %p168_p2 }
   0x6   : > { %p202_p4 = scmp.lt.s32.totalorder (!%p169_p3), %s777_s12, 1 }
   0x7   : > { %172 = sbr.rel (%p169_p3) target bundleno = 251 (0xfb), region = 32 }
   0xc   : > { %v748_v0 = vld [vmem:[%s892_s1 + $0x38] sm:$0xff]   ;;  %v787_v1 = vmov 0.0   ;;  %v750_v3 = vld [vmem:[%s892_s1 + $0x30] sm:$0xff]   ;;  %vm788_vm0 = vmmov 0   ;;  %s900_s12 = smov (!%p202_p4, %s777_s12), 1  ;;  %v752_v5 = vld [vmem:[%s892_s1 + $0x28] sm:$0xff]  }
   0xd   : > { %685 = vmatprep.subr.bf16.mxu0 %v787_v1  ;;  %697 = vmatprep.subr.bf16.mxu1 %v787_v1  ;;  %v749_v2 = vld [vmem:[%s892_s1 + $0x18] sm:$0xff]   ;;  %v751_v4 = vld [vmem:[%s892_s1 + $0x10] sm:$0xff]   ;;  %s721_s26 = smul.u32 12, %s900_s12  ;;  %v753_v6 = vld [vmem:[%s892_s1 + $0x8] sm:$0xff]   ;;  %vm251_vm1 = vsmask.f32 7424 }
   0xe   : > { %686 = vmatpush3.bf16.msra.mxu0 %v748_v0  ;;  %693 = vmatprep.mubr.msk.bf16.mxu0 %vm788_vm0, %v787_v1  ;;  %v754_v9 = vld [vmem:[%s892_s1 + $0x20] sm:$0xff]   ;;  %vm288_vm2 = vcmask 523264   ;;  %v758_v19 = vld [vmem:[%s892_s1 + $0x58] sm:$0xff]   ;;  %v759_v21 = vld [vmem:[%s892_s1 + $0x50] sm:$0xff]   ;;  %vm413_vm3 = vcmask 1046528   ;;  %s662_s23 = sshll.u32 %s900_s12, 3 }
   0xf   : > { %698 = vmatpush3.bf16.msra.mxu1 %v749_v2  ;;  %687 = vmatprep.subr.bf16.mxu0 %v787_v1  ;;  %s206_s4 = scalar_lea.vmem %s891_s0, %s721_s26  ;;  %v755_v12 = vld [vmem:[%s892_s1] sm:$0xff]   ;;  %v760_v23 = vld [vmem:[%s892_s1 + $0x48] sm:$0xff]   ;;  %s221_s26 = scalar_lea.vmem %s894_s3, %s662_s23 }
  0x10   : > { %699 = vmatprep.subr.bf16.mxu1 %v787_v1  ;;  %705 = vmatprep.mubr.msk.bf16.mxu1 %vm788_vm0, %v787_v1  ;;  %v223_v7 = vld [vmem:[%s206_s4] sm:$0xf]  ;;  %v224_v8 = vld [vmem:[%s206_s4 + $0x4] sm:$0xf] }
  0x11   : > { %v631_v10 = vcombine.low %v223_v7, %v224_v8  ;;  %v757_v11 = vld [vmem:[%s206_s4 + $0x8] ss:$0 sps:$4 sm:$0x11]   ;;  %v400_v22 = vld [vmem:[%s206_s4] sm:$0xe] }
  0x12   : > { %688 = vmatpush3.bf16.msra.mxu0 %v750_v3  ;;  %v260_v15 = vshll.u32 %v757_v11, 16  ;;  %v651_v24 = vcombine.low %v400_v22, %v224_v8  ;;  %v761_v25 = vld [vmem:[%s892_s1 + $0x40] sm:$0xff]   ;;  %v415_v27 = vrot.slane %v757_v11, 1 }
  0x13   : > { %700 = vmatpush3.bf16.msra.mxu1 %v751_v4  ;;  %689 = vmatprep.subr.bf16.mxu0 %v787_v1  ;;  %v253_v13 = vshrl.u32 %v631_v10, 16  ;;  %v255_v14 = vshll.u32 %v631_v10, 16  ;;  %v657_v40 = vld [vmem:[%s893_s2] ss:$0 sm:$0xff] }
  0x14   : > { %701 = vmatprep.subr.bf16.mxu1 %v787_v1  ;;  %v262_v17 = vrot.slane %v260_v15, 1  ;;  %v414_v26 = vrot.slane %v651_v24, 1 }
  0x15   : > { %v257_v16 = vrot.slane %v255_v14, 1 }
  0x16   : > { %690 = vmatpush3.bf16.msra.mxu0 %v752_v5  ;;  %v416_v28 = vsel %vm413_vm3, %v414_v26, %v415_v27 }
  0x17   : > { %702 = vmatpush3.bf16.msra.mxu1 %v753_v6  ;;  %691 = vmatprep.subr.bf16.mxu0 %v787_v1  ;;  %v258_v18 = vor.u32 %v257_v16, %v253_v13 }
  0x18   : > { %703 = vmatprep.subr.bf16.mxu1 %v787_v1 }
  0x19   : > { %v263_v20 = vsel %vm251_vm1, %v258_v18, %v262_v17 }
  0x1a   : > { %692 = vmatpush3.bf16.msra.mxu0 %v754_v9 }
  0x1b   : > { %704 = vmatpush3.bf16.msra.mxu1 %v755_v12  ;;  %709 = vmatprep.subr.bf16.mxu0 %v787_v1 }
  0x1d   : > { %694 = vmatmul.mubr.msk.bf16.vlgmr.msra.gmra.mxu0 %vm288_vm2, %v263_v20 }
  0x1e   : > { %706 = vmatmul.mubr.msk.bf16.vlgmr.msra.gmra.mxu1 %vm288_vm2, %v631_v10  ;;  %710 = vmatpush3.bf16.msra.mxu0 %v758_v19 }
  0x1f   : > { %717 = vmatprep.mubr.msk.bf16.mxu0 %vm788_vm0, %v787_v1  ;;  %711 = vmatprep.subr.bf16.mxu0 %v787_v1 }
  0x22   : > { %712 = vmatpush3.bf16.msra.mxu0 %v759_v21 }
  0x23   : > { %713 = vmatprep.subr.bf16.mxu0 %v787_v1 }
  0x26   : > { %714 = vmatpush3.bf16.msra.mxu0 %v760_v23 }
  0x27   : > { %715 = vmatprep.subr.bf16.mxu0 %v787_v1 }
  0x2a   : > { %716 = vmatpush3.bf16.msra.mxu0 %v761_v25 }
  0x2d   : > { %718 = vmatmul.mubr.msk.bf16.vlgmr.msra.gmra.mxu0 %vm288_vm2, %v416_v28 }
  0xdd   : > { %v326_v30 = vpop.f32.mrf.mxu0 }
  0xde   : > { %v393_v29 = vpop.f32.mrf.mxu1 }
  0xdf   : > { %v695_v32 = vpop.f32.mrf.mxu0  ;;  %v394_v37 = vadd.f32 %v393_v29, %v326_v30 }
  0xe0   : > { %v707_v31 = vpop.f32.mrf.mxu1 }
  0xe1   : > { %v329_v34 = vpop.f32.mrf.mxu0 }
  0xe2   : > { %v396_v33 = vpop.f32.mrf.mxu1 }
  0xe3   : > { %v696_v36 = vpop.f32.mrf.mxu0  ;;  %v397_v42 = vadd.f32 %v396_v33, %v329_v34 }
  0xe4   : > { %v708_v35 = vpop.f32.mrf.mxu1 }
  0xed   : > { %v478_v38 = vpop.f32.mrf.mxu0 }
  0xee   : > { %v485_v39 = vadd.f32 %v478_v38, %v394_v37 }
  0xef   : > { %v719_v41 = vpop.f32.mrf.mxu0 }
  0xf0   : > { %v494_v44 = vadd.f32 %v657_v40, %v485_v39 }
  0xf1   : > { %v481_v43 = vpop.f32.mrf.mxu0 }
  0xf2   : > { %v486_v45 = vadd.f32 %v481_v43, %v397_v42  ;;  %v496_v48 = vmax.f32 %v494_v44, 0.0 }
  0xf3   : > { %v720_v46 = vpop.f32.mrf.mxu0 }
  0xf4   : > { %v495_v47 = vadd.f32 %v657_v40, %v486_v45 }
  0xf6   : > { %v497_v49 = vmax.f32 %v495_v47, 0.0 }
  0xf8   : > { %v668_v50 = vpack.c.bf16 %v497_v49, %v496_v48 }
  0xfa   : > { %669 = vst [vmem:[%s221_s26] sm:$0xff] %v668_v50  }
  0xfb PF: > { %s13_s14 = sadd.s32 1, %s785_s14   ;;  %s895_s12 = smov %s781_s13 }
  0xfc   : > { %p10_p5 = scmp.ge.s32.totalorder %s13_s14, 4   ;;  %s896_s13 = smov %s898_s15 }
  0xfe   :  { %12 = sbr.rel (!%p10_p5) target bundleno = 2 (0x2), region = 70 }

</bundles_post_ra>
